<compile_context>
chip_gen: v6e
topology: v6e:2x2x1
jax: 0.10.0
libtpu: 0.0.40
codegen_flags: <defaults>
</compile_context>

<pallas_src>
import jax
import jax.numpy as jnp
from jax.experimental import pallas as pl
from jax.experimental.pallas import tpu as pltpu

_LANE = 128


def _round_up(v, m):
    return ((v + m - 1) // m) * m


# --------------------------------------------------------------------------
# Kernel: 4-layer MLP (Linear+ReLU x3, Linear), Linear #1 split into the
# non-species and embedded-species operands.  bf16 on the MXU, f32 accumulate.
# --------------------------------------------------------------------------
def _mlp_value_kernel(ns_ref, emb_ref,
                      w1ns_ref, w1sp_ref, b1_ref,
                      w2_ref, b2_ref,
                      w3_ref, b3_ref,
                      w4_ref, b4_ref,
                      out_ref):
    f32, bf16 = jnp.float32, jnp.bfloat16

    # Linear #1: combined = [non_species | embedded_species]  ->  two dots.
    h = jnp.dot(ns_ref[...], w1ns_ref[...], preferred_element_type=f32)
    h = h + jnp.dot(emb_ref[...], w1sp_ref[...], preferred_element_type=f32)
    h = jnp.maximum(h + b1_ref[...], 0.0).astype(bf16)

    h = jnp.maximum(jnp.dot(h, w2_ref[...], preferred_element_type=f32)
                    + b2_ref[...], 0.0).astype(bf16)
    h = jnp.maximum(jnp.dot(h, w3_ref[...], preferred_element_type=f32)
                    + b3_ref[...], 0.0).astype(bf16)

    # w4 is (H, 128) with only column 0 real -> full-width unmasked stores.
    out = jnp.dot(h, w4_ref[...], preferred_element_type=f32) + b4_ref[...]
    out_ref[...] = out.astype(out_ref.dtype)


# --------------------------------------------------------------------------
# Parameter construction / preparation
# --------------------------------------------------------------------------
def init_params(key, *, obs_dim, species_indices, embed_dim, vocab_size, hidden_size):
    """PyTorch-default-style init (uniform +-1/sqrt(fan_in) for Linear; the
    module's documented fallback nn.init.normal_(std=0.01) for the embedding)."""
    # TODO(synk): EmbeddingInitializer base-stat seeding needs external Pokemon
    # data; using the module's fallback normal(0, 0.01) init path.
    k_slots = len(species_indices)
    nsd = obs_dim - k_slots
    total_in = nsd + k_slots * embed_dim
    keys = jax.random.split(key, 9)

    def linear(kw, kb, fan_in, fan_out):
        bound = 1.0 / jnp.sqrt(jnp.float32(fan_in))
        w = jax.random.uniform(kw, (fan_in, fan_out), jnp.float32, -bound, bound)
        b = jax.random.uniform(kb, (1, fan_out), jnp.float32, -bound, bound)
        return w, b

    emb = 0.01 * jax.random.normal(keys[0], (vocab_size, embed_dim), jnp.float32)
    w1, b1 = linear(keys[1], keys[2], total_in, hidden_size)
    w2, b2 = linear(keys[3], keys[4], hidden_size, hidden_size * 2)
    w3, b3 = linear(keys[5], keys[6], hidden_size * 2, hidden_size)
    w4, b4 = linear(keys[7], keys[8], hidden_size, 1)
    return dict(emb=emb, w1=w1, b1=b1, w2=w2, b2=b2, w3=w3, b3=b3, w4=w4, b4=b4)


def prepare_kernel_params(params, *, species_indices):
    """One-time conversion of canonical f32 params to the kernel layout:
    bf16 weights/table, Linear #1 split into non-species / species slices,
    final layer lane-padded to 128 output columns."""
    bf16 = jnp.bfloat16
    emb = params["emb"]                                    # (V, E)
    _, embed_dim = emb.shape
    k_slots = len(species_indices)
    nsd = params["w1"].shape[0] - k_slots * embed_dim

    w1_ns = params["w1"][:nsd]                             # (NSD, H)
    w1_sp = params["w1"][nsd:]                             # (K*E, H)

    w4_pad = jnp.pad(params["w4"], ((0, 0), (0, _LANE - params["w4"].shape[1])))
    b4_pad = jnp.pad(params["b4"], ((0, 0), (0, _LANE - params["b4"].shape[1])))

    return dict(
        emb=emb.astype(bf16),
        w1_ns=w1_ns.astype(bf16), w1_sp=w1_sp.astype(bf16), b1=params["b1"],
        w2=params["w2"].astype(bf16), b2=params["b2"],
        w3=params["w3"].astype(bf16), b3=params["b3"],
        w4=w4_pad.astype(bf16), b4=b4_pad)


# --------------------------------------------------------------------------
# Forward wrapper
# --------------------------------------------------------------------------
def _split_features(x, species_indices):
    """Static-slice split when species indices are a contiguous range (the
    module's default), jnp.take fallback otherwise.  Non-species features keep
    ascending index order (matches the PyTorch boolean-mask extraction)."""
    obs_dim = x.shape[1]
    sp = [int(i) for i in species_indices]
    lo = min(sp)
    if sp == list(range(lo, lo + len(sp))):
        hi = lo + len(sp)
        ids_f = x[:, lo:hi]
        non_species = jnp.concatenate([x[:, :lo], x[:, hi:]], axis=1)
    else:
        sp_set = set(sp)
        ids_f = jnp.take(x, jnp.asarray(sp, jnp.int32), axis=1)
        ns_idx = jnp.asarray([i for i in range(obs_dim) if i not in sp_set], jnp.int32)
        non_species = jnp.take(x, ns_idx, axis=1)
    return non_species, ids_f


def _choose_tile_b(batch):
    """16-aligned (bf16 sublane packing) batch tile, capped at 512; for
    batch > 32 guarantee >= 2 grid steps so both v7x TensorCores get work."""
    if batch <= 32:
        return _round_up(max(batch, 1), 16)
    return min(512, _round_up(pl.cdiv(batch, 2), 16))


def embedding_value_forward(kparams, x, species_indices):
    """Pallas-backed forward: returns value tensor of shape [B] (scalar if x is 1-D)."""
    squeeze_output = (x.ndim == 1)
    if squeeze_output:
        x = x[None, :]
    batch = x.shape[0]
    vocab = kparams["emb"].shape[0]

    non_species_f32, ids_f = _split_features(x, species_indices)
    # torch .long() truncates; clamp so stray ids can never index out of range.
    ids = jnp.clip(ids_f.astype(jnp.int32), 0, vocab - 1)            # (B, K)

    # Embedding row gather (B, K, E) -> (B, K*E) bf16 with XLA's native gather.
    # TODO(synk): fold this gather into the kernel (jnp.take on the VMEM-resident
    # 72 KiB bf16 table) once Mosaic row-gather lowering is verified everywhere.
    emb_flat = kparams["emb"][ids].reshape(batch, -1)                 # (B, K*E) bf16
    non_species = non_species_f32.astype(jnp.bfloat16)                # (B, NSD)

    tile_b = _choose_tile_b(batch)
    b_pad = _round_up(batch, tile_b)
    if b_pad != batch:
        non_species = jnp.pad(non_species, ((0, b_pad - batch), (0, 0)))
        emb_flat = jnp.pad(emb_flat, ((0, b_pad - batch), (0, 0)))

    nsd = non_species.shape[1]
    kxe = emb_flat.shape[1]
    grid = (b_pad // tile_b,)

    const2 = lambda i: (0, 0)   # weights: constant block index -> VMEM-resident
    in_specs = [
        pl.BlockSpec((tile_b, nsd), lambda i: (i, 0)),
        pl.BlockSpec((tile_b, kxe), lambda i: (i, 0)),
        pl.BlockSpec(kparams["w1_ns"].shape, const2),
        pl.BlockSpec(kparams["w1_sp"].shape, const2),
        pl.BlockSpec(kparams["b1"].shape, const2),
        pl.BlockSpec(kparams["w2"].shape, const2),
        pl.BlockSpec(kparams["b2"].shape, const2),
        pl.BlockSpec(kparams["w3"].shape, const2),
        pl.BlockSpec(kparams["b3"].shape, const2),
        pl.BlockSpec(kparams["w4"].shape, const2),
        pl.BlockSpec(kparams["b4"].shape, const2),
    ]
    out_spec = pl.BlockSpec((tile_b, _LANE), lambda i: (i, 0))

    out = pl.pallas_call(
        _mlp_value_kernel,
        out_shape=jax.ShapeDtypeStruct((b_pad, _LANE), jnp.bfloat16),
        grid=grid,
        in_specs=in_specs,
        out_specs=out_spec,
        compiler_params=pltpu.CompilerParams(dimension_semantics=("parallel",)),
    )(non_species, emb_flat,
      kparams["w1_ns"], kparams["w1_sp"], kparams["b1"],
      kparams["w2"], kparams["b2"],
      kparams["w3"], kparams["b3"],
      kparams["w4"], kparams["b4"])

    value = out[:batch, 0].astype(jnp.float32)    # column 0 is real; .squeeze(-1)
    if squeeze_output:
        value = value[0]                          # .squeeze(0)
    return value


# --------------------------------------------------------------------------
# Pure-JAX f32 reference (mirrors the PyTorch module) for verification
# --------------------------------------------------------------------------
def reference_forward(params, x, species_indices):
    squeeze = (x.ndim == 1)
    if squeeze:
        x = x[None, :]
    obs_dim = x.shape[1]
    sp_idx = jnp.asarray(species_indices, jnp.int32)
    sp_set = set(int(i) for i in species_indices)
    ns_idx = jnp.asarray([i for i in range(obs_dim) if i not in sp_set], jnp.int32)

    ids = jnp.take(x, sp_idx, axis=1).astype(jnp.int32)
    emb = params["emb"][ids].reshape(x.shape[0], -1)
    combined = jnp.concatenate([jnp.take(x, ns_idx, axis=1), emb], axis=1)

    h = jnp.maximum(combined @ params["w1"] + params["b1"], 0.0)
    h = jnp.maximum(h @ params["w2"] + params["b2"], 0.0)
    h = jnp.maximum(h @ params["w3"] + params["b3"], 0.0)
    out = (h @ params["w4"] + params["b4"])[..., 0]
    return out[0] if squeeze else out


# --------------------------------------------------------------------------
if __name__ == "__main__":
    OBS_DIM = 64
    SPECIES_INDICES = list(range(40, 52))      # 12 contiguous species-id slots
    EMBED_DIM = 32
    VOCAB_SIZE = 1026
    HIDDEN_SIZE = 64

    root = jax.random.PRNGKey(0)
    k_params, k_feat, k_ids, k_feat2, k_ids2 = jax.random.split(root, 5)

    params = init_params(k_params, obs_dim=OBS_DIM, species_indices=SPECIES_INDICES,
                         embed_dim=EMBED_DIM, vocab_size=VOCAB_SIZE,
                         hidden_size=HIDDEN_SIZE)
    kparams = prepare_kernel_params(params, species_indices=SPECIES_INDICES)

    def make_obs(kf, ki, batch):
        xb = jax.random.normal(kf, (batch, OBS_DIM), jnp.float32)
        idb = jax.random.randint(ki, (batch, len(SPECIES_INDICES)), 0, VOCAB_SIZE)
        return xb.at[:, jnp.asarray(SPECIES_INDICES)].set(idb.astype(jnp.float32))

    # Small case (single tile, padded batch).
    x = make_obs(k_feat, k_ids, 2)
    out = jax.block_until_ready(embedding_value_forward(kparams, x, SPECIES_INDICES))
    ref = jax.block_until_ready(reference_forward(params, x, SPECIES_INDICES))
    assert out.shape == (2,), out.shape
    assert jnp.allclose(out, ref, atol=2e-2, rtol=2e-2), (out, ref)

    # Multi-tile case (exercises the 2-step batch grid, padding, resident weights).
    x2 = make_obs(k_feat2, k_ids2, 130)
    out2 = jax.block_until_ready(embedding_value_forward(kparams, x2, SPECIES_INDICES))
    ref2 = jax.block_until_ready(reference_forward(params, x2, SPECIES_INDICES))
    assert out2.shape == (130,), out2.shape
    assert jnp.allclose(out2, ref2, atol=2e-2, rtol=2e-2), (
        float(jnp.max(jnp.abs(out2 - ref2))))

    # 1-D input path (squeeze semantics of the PyTorch module).
    x1d = x[0]
    out1d = jax.block_until_ready(embedding_value_forward(kparams, x1d, SPECIES_INDICES))
    ref1d = jax.block_until_ready(reference_forward(params, x1d, SPECIES_INDICES))
    assert out1d.shape == (), out1d.shape
    assert jnp.allclose(out1d, ref1d, atol=2e-2, rtol=2e-2), (out1d, ref1d)

    print("KERNEL_OK")
</pallas_src>

<mosaic_0001>
module attributes {stable_mosaic.version = 11 : i64} {
  func.func @_mlp_value_kernel(%arg0: i32, %arg1: memref<16x52xbf16, #tpu.memory_space<vmem>>, %arg2: memref<16x384xbf16, #tpu.memory_space<vmem>>, %arg3: memref<52x64xbf16, #tpu.memory_space<vmem>>, %arg4: memref<384x64xbf16, #tpu.memory_space<vmem>>, %arg5: memref<1x64xf32, #tpu.memory_space<vmem>>, %arg6: memref<64x128xbf16, #tpu.memory_space<vmem>>, %arg7: memref<1x128xf32, #tpu.memory_space<vmem>>, %arg8: memref<128x64xbf16, #tpu.memory_space<vmem>>, %arg9: memref<1x64xf32, #tpu.memory_space<vmem>>, %arg10: memref<64x128xbf16, #tpu.memory_space<vmem>>, %arg11: memref<1x128xf32, #tpu.memory_space<vmem>>, %arg12: memref<16x128xbf16, #tpu.memory_space<vmem>>) attributes {dimension_semantics = [#tpu.dimension_semantics<parallel>], iteration_bounds = array<i64: 1>, scalar_prefetch = 0 : i64, scratch_operands = 0 : i64, tpu.core_type = #tpu.core_type<tc>, window_params = [{transform_indices = @transform_0, window_bounds = array<i64: 16, 52>}, {transform_indices = @transform_1, window_bounds = array<i64: 16, 384>}, {pipeline_mode = #tpu.pipeline_mode<synchronous>, transform_indices = @transform_2, window_bounds = array<i64: 52, 64>}, {pipeline_mode = #tpu.pipeline_mode<synchronous>, transform_indices = @transform_3, window_bounds = array<i64: 384, 64>}, {pipeline_mode = #tpu.pipeline_mode<synchronous>, transform_indices = @transform_4, window_bounds = array<i64: 1, 64>}, {pipeline_mode = #tpu.pipeline_mode<synchronous>, transform_indices = @transform_5, window_bounds = array<i64: 64, 128>}, {pipeline_mode = #tpu.pipeline_mode<synchronous>, transform_indices = @transform_6, window_bounds = array<i64: 1, 128>}, {pipeline_mode = #tpu.pipeline_mode<synchronous>, transform_indices = @transform_7, window_bounds = array<i64: 128, 64>}, {pipeline_mode = #tpu.pipeline_mode<synchronous>, transform_indices = @transform_8, window_bounds = array<i64: 1, 64>}, {pipeline_mode = #tpu.pipeline_mode<synchronous>, transform_indices = @transform_9, window_bounds = array<i64: 64, 128>}, {pipeline_mode = #tpu.pipeline_mode<synchronous>, transform_indices = @transform_10, window_bounds = array<i64: 1, 128>}, {transform_indices = @transform_11, window_bounds = array<i64: 16, 128>}]} {
    %c0 = arith.constant 0 : index
    %c0_0 = arith.constant 0 : index
    %0 = vector.load %arg1[%c0, %c0_0] : memref<16x52xbf16, #tpu.memory_space<vmem>>, vector<16x52xbf16>
    %c0_1 = arith.constant 0 : index
    %c0_2 = arith.constant 0 : index
    %1 = vector.load %arg3[%c0_1, %c0_2] : memref<52x64xbf16, #tpu.memory_space<vmem>>, vector<52x64xbf16>
    %cst = arith.constant dense<0.000000e+00> : vector<16x64xf32>
    %2 = tpu.matmul %0, %1, %cst {dimension_numbers = #tpu.dot_dimension_numbers<[1], [0], [0], [1], [0, 0, 1, 1], [], []>} : vector<16x52xbf16>, vector<52x64xbf16>, vector<16x64xf32> -> vector<16x64xf32>
    %c0_3 = arith.constant 0 : index
    %c0_4 = arith.constant 0 : index
    %3 = vector.load %arg2[%c0_3, %c0_4] : memref<16x384xbf16, #tpu.memory_space<vmem>>, vector<16x384xbf16>
    %c0_5 = arith.constant 0 : index
    %c0_6 = arith.constant 0 : index
    %4 = vector.load %arg4[%c0_5, %c0_6] : memref<384x64xbf16, #tpu.memory_space<vmem>>, vector<384x64xbf16>
    %cst_7 = arith.constant dense<0.000000e+00> : vector<16x64xf32>
    %5 = tpu.matmul %3, %4, %cst_7 {dimension_numbers = #tpu.dot_dimension_numbers<[1], [0], [0], [1], [0, 0, 1, 1], [], []>} : vector<16x384xbf16>, vector<384x64xbf16>, vector<16x64xf32> -> vector<16x64xf32>
    %6 = arith.addf %2, %5 : vector<16x64xf32>
    %c0_8 = arith.constant 0 : index
    %c0_9 = arith.constant 0 : index
    %7 = vector.load %arg5[%c0_8, %c0_9] : memref<1x64xf32, #tpu.memory_space<vmem>>, vector<1x64xf32>
    %8 = vector.broadcast %7 : vector<1x64xf32> to vector<16x64xf32>
    %9 = arith.addf %6, %8 : vector<16x64xf32>
    %cst_10 = arith.constant 0.000000e+00 : f32
    %10 = vector.broadcast %cst_10 : f32 to vector<16x64xf32>
    %11 = arith.maximumf %9, %10 : vector<16x64xf32>
    %12 = arith.truncf %11 : vector<16x64xf32> to vector<16x64xbf16>
    %c0_11 = arith.constant 0 : index
    %c0_12 = arith.constant 0 : index
    %13 = vector.load %arg6[%c0_11, %c0_12] : memref<64x128xbf16, #tpu.memory_space<vmem>>, vector<64x128xbf16>
    %cst_13 = arith.constant dense<0.000000e+00> : vector<16x128xf32>
    %14 = tpu.matmul %12, %13, %cst_13 {dimension_numbers = #tpu.dot_dimension_numbers<[1], [0], [0], [1], [0, 0, 1, 1], [], []>} : vector<16x64xbf16>, vector<64x128xbf16>, vector<16x128xf32> -> vector<16x128xf32>
    %c0_14 = arith.constant 0 : index
    %c0_15 = arith.constant 0 : index
    %15 = vector.load %arg7[%c0_14, %c0_15] : memref<1x128xf32, #tpu.memory_space<vmem>>, vector<1x128xf32>
    %16 = vector.broadcast %15 : vector<1x128xf32> to vector<16x128xf32>
    %17 = arith.addf %14, %16 : vector<16x128xf32>
    %cst_16 = arith.constant 0.000000e+00 : f32
    %18 = vector.broadcast %cst_16 : f32 to vector<16x128xf32>
    %19 = arith.maximumf %17, %18 : vector<16x128xf32>
    %20 = arith.truncf %19 : vector<16x128xf32> to vector<16x128xbf16>
    %c0_17 = arith.constant 0 : index
    %c0_18 = arith.constant 0 : index
    %21 = vector.load %arg8[%c0_17, %c0_18] : memref<128x64xbf16, #tpu.memory_space<vmem>>, vector<128x64xbf16>
    %cst_19 = arith.constant dense<0.000000e+00> : vector<16x64xf32>
    %22 = tpu.matmul %20, %21, %cst_19 {dimension_numbers = #tpu.dot_dimension_numbers<[1], [0], [0], [1], [0, 0, 1, 1], [], []>} : vector<16x128xbf16>, vector<128x64xbf16>, vector<16x64xf32> -> vector<16x64xf32>
    %c0_20 = arith.constant 0 : index
    %c0_21 = arith.constant 0 : index
    %23 = vector.load %arg9[%c0_20, %c0_21] : memref<1x64xf32, #tpu.memory_space<vmem>>, vector<1x64xf32>
    %24 = vector.broadcast %23 : vector<1x64xf32> to vector<16x64xf32>
    %25 = arith.addf %22, %24 : vector<16x64xf32>
    %cst_22 = arith.constant 0.000000e+00 : f32
    %26 = vector.broadcast %cst_22 : f32 to vector<16x64xf32>
    %27 = arith.maximumf %25, %26 : vector<16x64xf32>
    %28 = arith.truncf %27 : vector<16x64xf32> to vector<16x64xbf16>
    %c0_23 = arith.constant 0 : index
    %c0_24 = arith.constant 0 : index
    %29 = vector.load %arg10[%c0_23, %c0_24] : memref<64x128xbf16, #tpu.memory_space<vmem>>, vector<64x128xbf16>
    %cst_25 = arith.constant dense<0.000000e+00> : vector<16x128xf32>
    %30 = tpu.matmul %28, %29, %cst_25 {dimension_numbers = #tpu.dot_dimension_numbers<[1], [0], [0], [1], [0, 0, 1, 1], [], []>} : vector<16x64xbf16>, vector<64x128xbf16>, vector<16x128xf32> -> vector<16x128xf32>
    %c0_26 = arith.constant 0 : index
    %c0_27 = arith.constant 0 : index
    %31 = vector.load %arg11[%c0_26, %c0_27] : memref<1x128xf32, #tpu.memory_space<vmem>>, vector<1x128xf32>
    %32 = vector.broadcast %31 : vector<1x128xf32> to vector<16x128xf32>
    %33 = arith.addf %30, %32 : vector<16x128xf32>
    %34 = arith.truncf %33 : vector<16x128xf32> to vector<16x128xbf16>
    %c0_28 = arith.constant 0 : index
    %c0_29 = arith.constant 0 : index
    %35 = vector.load %arg12[%c0_28, %c0_29] : memref<16x128xbf16, #tpu.memory_space<vmem>>, vector<16x128xbf16>
    tpu.vector_store %arg12[%c0_28, %c0_29], %34 {strides = array<i32>} : memref<16x128xbf16, #tpu.memory_space<vmem>>, vector<16x128xbf16>,
    return
  }
  func.func @transform_0(%arg0: i32) -> (i32, i32) {
    %c0_i32 = arith.constant 0 : i32
    %c0_i32_0 = arith.constant 0 : i32
    return %arg0, %c0_i32 : i32, i32
  }
  func.func @transform_1(%arg0: i32) -> (i32, i32) {
    %c0_i32 = arith.constant 0 : i32
    %c0_i32_0 = arith.constant 0 : i32
    return %arg0, %c0_i32 : i32, i32
  }
  func.func @transform_2(%arg0: i32) -> (i32, i32) {
    %c0_i32 = arith.constant 0 : i32
    %c0_i32_0 = arith.constant 0 : i32
    %c0_i32_1 = arith.constant 0 : i32
    return %c0_i32, %c0_i32_0 : i32, i32
  }
  func.func @transform_3(%arg0: i32) -> (i32, i32) {
    %c0_i32 = arith.constant 0 : i32
    %c0_i32_0 = arith.constant 0 : i32
    %c0_i32_1 = arith.constant 0 : i32
    return %c0_i32, %c0_i32_0 : i32, i32
  }
  func.func @transform_4(%arg0: i32) -> (i32, i32) {
    %c0_i32 = arith.constant 0 : i32
    %c0_i32_0 = arith.constant 0 : i32
    %c0_i32_1 = arith.constant 0 : i32
    return %c0_i32, %c0_i32_0 : i32, i32
  }
  func.func @transform_5(%arg0: i32) -> (i32, i32) {
    %c0_i32 = arith.constant 0 : i32
    %c0_i32_0 = arith.constant 0 : i32
    %c0_i32_1 = arith.constant 0 : i32
    return %c0_i32, %c0_i32_0 : i32, i32
  }
  func.func @transform_6(%arg0: i32) -> (i32, i32) {
    %c0_i32 = arith.constant 0 : i32
    %c0_i32_0 = arith.constant 0 : i32
    %c0_i32_1 = arith.constant 0 : i32
    return %c0_i32, %c0_i32_0 : i32, i32
  }
  func.func @transform_7(%arg0: i32) -> (i32, i32) {
    %c0_i32 = arith.constant 0 : i32
    %c0_i32_0 = arith.constant 0 : i32
    %c0_i32_1 = arith.constant 0 : i32
    return %c0_i32, %c0_i32_0 : i32, i32
  }
  func.func @transform_8(%arg0: i32) -> (i32, i32) {
    %c0_i32 = arith.constant 0 : i32
    %c0_i32_0 = arith.constant 0 : i32
    %c0_i32_1 = arith.constant 0 : i32
    return %c0_i32, %c0_i32_0 : i32, i32
  }
  func.func @transform_9(%arg0: i32) -> (i32, i32) {
    %c0_i32 = arith.constant 0 : i32
    %c0_i32_0 = arith.constant 0 : i32
    %c0_i32_1 = arith.constant 0 : i32
    return %c0_i32, %c0_i32_0 : i32, i32
  }
  func.func @transform_10(%arg0: i32) -> (i32, i32) {
    %c0_i32 = arith.constant 0 : i32
    %c0_i32_0 = arith.constant 0 : i32
    %c0_i32_1 = arith.constant 0 : i32
    return %c0_i32, %c0_i32_0 : i32, i32
  }
  func.func @transform_11(%arg0: i32) -> (i32, i32) {
    %c0_i32 = arith.constant 0 : i32
    %c0_i32_0 = arith.constant 0 : i32
    return %arg0, %c0_i32 : i32, i32
  }
}

</mosaic_0001>

<bundles_post_ra>
// kernel: tpu_custom_call.1
= control target key start
LH: loop header
LB: loop body
LE: loop exit
PB: predicated region body
PF: predicated region fallthrough
CT: control target
= control target key end

     0   :  { %v1012_v2 = vmov 0.0   ;;  %vm1013_vm0 = vmmov 0   ;;  %vm373_vm1 = vcmask 1041408   ;;  %s1276_s0 = inlined_call_operand.vmem [shape: bf16[16,52], index: 0, kind: input, shape index: {}]   ;;  %s1277_s1 = inlined_call_operand.vmem [shape: bf16[16,384], index: 1, kind: input, shape index: {}]   ;;  %s1278_s2 = inlined_call_operand.vmem [shape: bf16[52,64], index: 2, kind: input, shape index: {}]   ;;  %s1279_s3 = inlined_call_operand.vmem [shape: bf16[384,64], index: 3, kind: input, shape index: {}]   ;;  %s1280_s4 = inlined_call_operand.vmem [shape: f32[1,64], index: 4, kind: input, shape index: {}]   ;;  %s1281_s5 = inlined_call_operand.vmem [shape: bf16[64,128], index: 5, kind: input, shape index: {}]   ;;  %s1282_s6 = inlined_call_operand.vmem [shape: f32[1,128], index: 6, kind: input, shape index: {}]   ;;  %s1283_s7 = inlined_call_operand.vmem [shape: bf16[128,64], index: 7, kind: input, shape index: {}]   ;;  %s1284_s8 = inlined_call_operand.vmem [shape: f32[1,64], index: 8, kind: input, shape index: {}]   ;;  %s1285_s9 = inlined_call_operand.vmem [shape: bf16[64,128], index: 9, kind: input, shape index: {}]   ;;  %s1286_s10 = inlined_call_operand.vmem [shape: f32[1,128], index: 10, kind: input, shape index: {}]   ;;  %s1287_s11 = inlined_call_operand.hbm [shape: bf16[16,128], index: 11, kind: output, shape index: {}]  }
   0x1   :  { %v941_v0 = vld [vmem:[%s1279_s3 + $0x78] sm:$0xff]   ;;  %860 = vmatprep.subr.bf16.mxu1 %v1012_v2  ;;  %v943_v3 = vld [vmem:[%s1279_s3 + $0x70] sm:$0xff]   ;;  %876 = vmatprep.mubr.msk.bf16.mxu1 %vm1013_vm0, %v1012_v2  ;;  %v946_v6 = vld [vmem:[%s1279_s3 + $0x68] sm:$0xff]  }
   0x2   :  { %v942_v1 = vld [vmem:[%s1279_s3 + $0x38] sm:$0xff]   ;;  %805 = vmatprep.subr.bf16.mxu0 %v941_v0  ;;  %v944_v4 = vld [vmem:[%s1279_s3 + $0x30] sm:$0xff]   ;;  %v947_v7 = vld [vmem:[%s1279_s3 + $0x28] sm:$0xff]  }
   0x3   :  { %806 = vmatpush3.bf16.msra.mxu0 %v942_v1  ;;  %v945_v5 = vld [vmem:[%s1279_s3 + $0xb8] sm:$0xff]   ;;  %v948_v8 = vld [vmem:[%s1279_s3 + $0xb0] sm:$0xff]   ;;  %v949_v9 = vld [vmem:[%s1279_s3 + $0x60] sm:$0xff]  }
   0x4   :  { %807 = vmatprep.subr.bf16.mxu0 %v943_v3  ;;  %861 = vmatpush3.bf16.msra.mxu1 %v945_v5  ;;  %v951_v10 = vld [vmem:[%s1279_s3 + $0xa8] sm:$0xff]   ;;  %v950_v11 = vld [vmem:[%s1279_s3 + $0x20] sm:$0xff]   ;;  %v952_v12 = vld [vmem:[%s1279_s3 + $0x58] sm:$0xff]  }
   0x5   :  { %862 = vmatprep.subr.bf16.mxu1 %v1012_v2  ;;  %v954_v13 = vld [vmem:[%s1279_s3 + $0xa0] sm:$0xff]   ;;  %v953_v14 = vld [vmem:[%s1279_s3 + $0x18] sm:$0xff]   ;;  %v955_v15 = vld [vmem:[%s1279_s3 + $0x50] sm:$0xff]  }
   0x6   :  { %v957_v16 = vld [vmem:[%s1279_s3 + $0x98] sm:$0xff]   ;;  %v956_v17 = vld [vmem:[%s1279_s3 + $0x10] sm:$0xff]   ;;  %v958_v18 = vld [vmem:[%s1279_s3 + $0x48] sm:$0xff]  }
   0x7   :  { %808 = vmatpush3.bf16.msra.mxu0 %v944_v4  ;;  %v959_v19 = vld [vmem:[%s1279_s3 + $0x8] sm:$0xff]   ;;  %v960_v20 = vld [vmem:[%s1279_s3 + $0x90] sm:$0xff]   ;;  %v961_v21 = vld [vmem:[%s1279_s3 + $0x40] sm:$0xff]  }
   0x8   :  { %809 = vmatprep.subr.bf16.mxu0 %v946_v6  ;;  %863 = vmatpush3.bf16.msra.mxu1 %v948_v8  ;;  %v966_v22 = vld [vmem:[%s1277_s1 + $0x4] ss:$12 sps:$4 sm:$0xff]   ;;  %v968_v23 = vld [vmem:[%s1278_s2 + $0x18] ss:$0 sps:$4 sm:$0x33]   ;;  %v963_v24 = vld [vmem:[%s1279_s3 + $0x88] sm:$0xff]  }
   0x9   :  { %864 = vmatprep.subr.bf16.mxu1 %v1012_v2  ;;  %293 = vmatprep.mubr.bf16.mxu0 %v966_v22  ;;  %v962_v25 = vld [vmem:[%s1279_s3] sm:$0xff]   ;;  %v375_v28 = vsel %vm373_vm1, %v968_v23, 0  ;;  %v969_v29 = vld [vmem:[%s1277_s1 + $0x8] ss:$12 sps:$4 sm:$0xff]  }
   0xa   :  { %v964_v26 = vld [vmem:[%s1277_s1] ss:$12 sps:$4 sm:$0xff]   ;;  %v970_v30 = vld [vmem:[%s1278_s2 + $0x10] sm:$0xff]  }
   0xb   :  { %810 = vmatpush3.bf16.msra.mxu0 %v947_v7  ;;  %v967_v27 = vld [vmem:[%s1279_s3 + $0x80] sm:$0xff]   ;;  %v971_v31 = vld [vmem:[%s1278_s2 + $0x8] sm:$0xff]  }
   0xc   :  { %811 = vmatprep.subr.bf16.mxu0 %v949_v9  ;;  %865 = vmatpush3.bf16.msra.mxu1 %v951_v10 }
   0xd   :  { %866 = vmatprep.subr.bf16.mxu1 %v1012_v2 }
   0xf   :  { %812 = vmatpush3.bf16.msra.mxu0 %v950_v11 }
  0x10   :  { %813 = vmatprep.subr.bf16.mxu0 %v952_v12  ;;  %867 = vmatpush3.bf16.msra.mxu1 %v954_v13 }
  0x11   :  { %868 = vmatprep.subr.bf16.mxu1 %v1012_v2 }
  0x13   :  { %814 = vmatpush3.bf16.msra.mxu0 %v953_v14 }
  0x14   :  { %815 = vmatprep.subr.bf16.mxu0 %v955_v15  ;;  %869 = vmatpush3.bf16.msra.mxu1 %v957_v16 }
  0x15   :  { %870 = vmatprep.subr.bf16.mxu1 %v1012_v2 }
  0x17   :  { %816 = vmatpush3.bf16.msra.mxu0 %v956_v17 }
  0x18   :  { %817 = vmatprep.subr.bf16.mxu0 %v958_v18  ;;  %871 = vmatpush3.bf16.msra.mxu1 %v960_v20 }
  0x19   :  { %872 = vmatprep.subr.bf16.mxu1 %v1012_v2 }
  0x1b   :  { %818 = vmatpush3.bf16.msra.mxu0 %v959_v19 }
  0x1c   :  { %819 = vmatprep.subr.bf16.mxu0 %v961_v21  ;;  %873 = vmatpush3.bf16.msra.mxu1 %v963_v24 }
  0x1d   :  { %874 = vmatprep.subr.bf16.mxu1 %v1012_v2 }
  0x1f   :  { %820 = vmatpush3.bf16.msra.mxu0 %v962_v25 }
  0x20   :  { %880 = vmatprep.subr.bf16.mxu0 %v1012_v2  ;;  %875 = vmatpush3.bf16.msra.mxu1 %v967_v27 }
  0x21   :  { %892 = vmatprep.subr.bf16.mxu1 %v1012_v2 }
  0x22   :  { %294 = vmatmul.mubr.bf16.vlgmr.msra.gmra.mxu0 %v964_v26 }
  0x23   :  { %881 = vmatpush3.bf16.msra.mxu0 %v375_v28  ;;  %888 = vmatprep.mubr.msk.bf16.mxu0 %vm1013_vm0, %v1012_v2 }
  0x24   :  { %882 = vmatprep.subr.bf16.mxu0 %v1012_v2  ;;  %877 = vmatmul.mubr.bf16.vlgmr.msra.gmra.mxu1 %v969_v29 }
  0x25   :  { %900 = vmatprep.mubr.msk.bf16.mxu1 %vm1013_vm0, %v1012_v2 }
  0x27   :  { %883 = vmatpush3.bf16.msra.mxu0 %v970_v30 }
  0x28   :  { %884 = vmatprep.subr.bf16.mxu0 %v1012_v2 }
  0x29   :  { %16 = vsyncpa [#allocation3], 0  ;;  %v972_v32 = vld [vmem:[%s1278_s2] sm:$0xff]   ;;  %vm369_vm2 = vcmask 424960   ;;  %v974_v34 = vld [vmem:[%s1281_s5 + $0x18] sm:$0xff]   ;;  %vm469_vm3 = vcmask 523264  }
  0x2a   :  { %v973_v33 = vld [vmem:[%s1276_s0] sm:$0xff]   ;;  %893 = vmatpush3.bf16.msra.mxu1 %v974_v34  ;;  %v975_v35 = vld [vmem:[%s1281_s5 + $0x10] sm:$0xff]   ;;  %v976_v36 = vld [vmem:[%s1281_s5 + $0x8] sm:$0xff]  }
  0x2b   :  { %885 = vmatpush3.bf16.msra.mxu0 %v971_v31  ;;  %894 = vmatprep.subr.bf16.mxu1 %v1012_v2  ;;  %v977_v37 = vld [vmem:[%s1281_s5] sm:$0xff]   ;;  %v978_v38 = vld [vmem:[%s1283_s7 + $0x38] sm:$0xff]   ;;  %v979_v39 = vld [vmem:[%s1283_s7 + $0x30] sm:$0xff]  }
  0x2c   :  { %886 = vmatprep.subr.bf16.mxu0 %v1012_v2  ;;  %v980_v40 = vld [vmem:[%s1283_s7 + $0x28] sm:$0xff]   ;;  %v981_v41 = vld [vmem:[%s1283_s7 + $0x20] sm:$0xff]   ;;  %v982_v42 = vld [vmem:[%s1283_s7 + $0x18] sm:$0xff]  }
  0x2d   :  { %v774_v56 = vld [vmem:[%s1280_s4] ss:$0 sm:$0xff]  ;;  %v983_v4 = vld [vmem:[%s1283_s7 + $0x10] sm:$0xff]   ;;  %v984_v5 = vld [vmem:[%s1283_s7 + $0x8] sm:$0xff]  }
  0x2e   :  { %895 = vmatpush3.bf16.msra.mxu1 %v975_v35  ;;  %v985_v6 = vld [vmem:[%s1283_s7] sm:$0xff]   ;;  %v986_v7 = vld [vmem:[%s1285_s9 + $0x18] sm:$0xff]   ;;  %v987_v18 = vld [vmem:[%s1285_s9 + $0x10] sm:$0xff]  }
  0x2f   :  { %887 = vmatpush3.bf16.msra.mxu0 %v972_v32  ;;  %896 = vmatprep.subr.bf16.mxu1 %v1012_v2  ;;  %v775_v8 = vld [vmem:[%s1282_s6] ss:$0 sm:$0xff]  ;;  %v988_v19 = vld [vmem:[%s1285_s9 + $0x8] sm:$0xff]  }
  0x30   :  { %904 = vmatprep.subr.bf16.mxu0 %v1012_v2  ;;  %v989_v20 = vld [vmem:[%s1285_s9] sm:$0xff]   ;;  %s1014_s9 = smov [#allocation2]  }
  0x31   :  { %v781_v21 = vld [vmem:[%s1284_s8] ss:$0 sm:$0xff]  ;;  %s730_s14 = sshll.u32 %s1014_s9, 4  ;;  %s731_s14 = int_to_ptr.vmem [resolvable:$true] %s730_s14 }
  0x32   :  { %889 = vmatmul.mubr.msk.bf16.vlgmr.msra.gmra.mxu0 %vm369_vm2, %v973_v33  ;;  %897 = vmatpush3.bf16.msra.mxu1 %v976_v36  ;;  %v790_v31 = vld [vmem:[%s1286_s10] ss:$0 sm:$0xff]  ;;  %s990_s8 = scalar_lea.vmem %s731_s14, 128  ;;  %p995_p1 = scmp.lt.s32.totalorder %s731_s14, %s731_s14 }
  0x33   :  { %920 = vmatprep.mubr.msk.bf16.mxu0 %vm1013_vm0, %v1012_v2  ;;  %898 = vmatprep.subr.bf16.mxu1 %v1012_v2  ;;  %p991_p0 = scmp.ne.s32.totalorder %s731_s14, %s990_s8  ;;  %p996_p2 = scmp.lt.s32.totalorder %s990_s8, %s990_s8 }
  0x34   :  { %905 = vmatpush3.bf16.msra.mxu0 %v978_v38 }
  0x35   :  { %906 = vmatprep.subr.bf16.mxu0 %v1012_v2  ;;  %p997_p3 = por %p996_p2, %p995_p1 }
  0x36   :  { %899 = vmatpush3.bf16.msra.mxu1 %v977_v37 }
  0x37   :  { %924 = vmatprep.subr.bf16.mxu1 %v1012_v2  ;;  %p998_p4 = pnand %p997_p3, %p991_p0 }
  0x38   :  { %907 = vmatpush3.bf16.msra.mxu0 %v979_v39 }
  0x39   :  { %908 = vmatprep.subr.bf16.mxu0 %v1012_v2 }
  0x3c   :  { %909 = vmatpush3.bf16.msra.mxu0 %v980_v40 }
  0x3d   :  { %910 = vmatprep.subr.bf16.mxu0 %v1012_v2 }
  0x40   :  { %911 = vmatpush3.bf16.msra.mxu0 %v981_v41 }
  0x41   :  { %912 = vmatprep.subr.bf16.mxu0 %v1012_v2 }
  0x44   :  { %913 = vmatpush3.bf16.msra.mxu0 %v982_v42 }
  0x45   :  { %914 = vmatprep.subr.bf16.mxu0 %v1012_v2 }
  0x48   :  { %915 = vmatpush3.bf16.msra.mxu0 %v983_v4 }
  0x49   :  { %916 = vmatprep.subr.bf16.mxu0 %v1012_v2 }
  0x4c   :  { %917 = vmatpush3.bf16.msra.mxu0 %v984_v5 }
  0x4d   :  { %918 = vmatprep.subr.bf16.mxu0 %v1012_v2 }
  0x50   :  { %919 = vmatpush3.bf16.msra.mxu0 %v985_v6 }
  0xe2   :  { %v821_v43 = vpop.f32.mrf.mxu0 }
  0xe4   :  { %v336_v44 = vpop.f32.mrf.mxu1  ;;  %v822_v45 = vpop.f32.mrf.mxu0 }
  0xe5   :  { %v823_v50 = vadd.f32 %v822_v45, %v821_v43 }
  0xe6   :  { %v878_v46 = vpop.f32.mrf.mxu1  ;;  %v824_v48 = vpop.f32.mrf.mxu0 }
  0xe7   :  { %v337_v52 = vadd.f32 %v823_v50, %v336_v44 }
  0xe8   :  { %v339_v47 = vpop.f32.mrf.mxu1  ;;  %v825_v51 = vpop.f32.mrf.mxu0 }
  0xe9   :  { %v826_v53 = vadd.f32 %v825_v51, %v824_v48 }
  0xea   :  { %v879_v49 = vpop.f32.mrf.mxu1 }
  0xeb   :  { %v340_v58 = vadd.f32 %v826_v53, %v339_v47 }
  0xf2   :  { %v411_v54 = vpop.f32.mrf.mxu0 }
  0xf3   :  { %v412_v55 = vadd.f32 %v411_v54, %v337_v52 }
  0xf4   :  { %v890_v57 = vpop.f32.mrf.mxu0 }
  0xf5   :  { %v425_v60 = vadd.f32 %v774_v56, %v412_v55 }
  0xf6   :  { %v414_v59 = vpop.f32.mrf.mxu0 }
  0xf7   :  { %v415_v61 = vadd.f32 %v414_v59, %v340_v58  ;;  %v427_v0 = vmax.f32 %v425_v60, 0.0 }
  0xf8   :  { %v891_v62 = vpop.f32.mrf.mxu0 }
  0xf9   :  { %v426_v63 = vadd.f32 %v774_v56, %v415_v61 }
  0xfb   :  { %v428_v1 = vmax.f32 %v426_v63, 0.0 }
  0xfd   :  { %v429_v3 = vpack.c.bf16 %v428_v1, %v427_v0 }
  0xff   :  { %901 = vmatmul.mubr.msk.bf16.vlgmr.msra.gmra.mxu1 %vm469_vm3, %v429_v3 }
 0x100   :  { %932 = vmatprep.mubr.msk.bf16.mxu1 %vm1013_vm0, %v1012_v2  ;;  %925 = vmatpush3.bf16.msra.mxu1 %v986_v7 }
 0x101   :  { %926 = vmatprep.subr.bf16.mxu1 %v1012_v2 }
 0x104   :  { %927 = vmatpush3.bf16.msra.mxu1 %v987_v18 }
 0x105   :  { %928 = vmatprep.subr.bf16.mxu1 %v1012_v2 }
 0x108   :  { %929 = vmatpush3.bf16.msra.mxu1 %v988_v19 }
 0x109   :  { %930 = vmatprep.subr.bf16.mxu1 %v1012_v2 }
 0x10c   :  { %931 = vmatpush3.bf16.msra.mxu1 %v989_v20 }
 0x1bf   :  { %v507_v9 = vpop.f32.mrf.mxu1 }
 0x1c0   :  { %v508_v11 = vadd.f32 %v775_v8, %v507_v9 }
 0x1c1   :  { %v902_v10 = vpop.f32.mrf.mxu1 }
 0x1c2   :  { %v514_v15 = vmax.f32 %v508_v11, 0.0 }
 0x1c3   :  { %v510_v12 = vpop.f32.mrf.mxu1 }
 0x1c4   :  { %v511_v13 = vadd.f32 %v775_v8, %v510_v12 }
 0x1c5   :  { %v903_v14 = vpop.f32.mrf.mxu1 }
 0x1c6   :  { %v515_v16 = vmax.f32 %v511_v13, 0.0 }
 0x1c8   :  { %v516_v17 = vpack.c.bf16 %v515_v16, %v514_v15 }
 0x1ca   :  { %921 = vmatmul.mubr.bf16.vlgmr.msra.gmra.mxu0 %v516_v17 }
 0x28a   :  { %v622_v22 = vpop.f32.mrf.mxu0 }
 0x28b   :  { %v623_v24 = vadd.f32 %v781_v21, %v622_v22 }
 0x28c   :  { %v922_v23 = vpop.f32.mrf.mxu0 }
 0x28d   :  { %v629_v28 = vmax.f32 %v623_v24, 0.0 }
 0x28e   :  { %v625_v25 = vpop.f32.mrf.mxu0 }
 0x28f   :  { %v626_v26 = vadd.f32 %v781_v21, %v625_v25 }
 0x290   :  { %v923_v27 = vpop.f32.mrf.mxu0 }
 0x291   :  { %v630_v29 = vmax.f32 %v626_v26, 0.0 }
 0x293   :  { %v631_v30 = vpack.c.bf16 %v630_v29, %v629_v28 }
 0x295   :  { %933 = vmatmul.mubr.msk.bf16.vlgmr.msra.gmra.mxu1 %vm469_vm3, %v631_v30 }
 0x355   :  { %v708_v2 = vpop.f32.mrf.mxu1 }
 0x356   :  { %v709_v34 = vadd.f32 %v790_v31, %v708_v2 }
 0x357   :  { %v934_v32 = vpop.f32.mrf.mxu1 }
 0x359   :  { %v711_v33 = vpop.f32.mrf.mxu1 }
 0x35a   :  { %v712_v35 = vadd.f32 %v790_v31, %v711_v33 }
 0x35b   :  { %v935_v36 = vpop.f32.mrf.mxu1 }
 0x35c   :  { %v803_v37 = vpack.c.bf16 %v712_v35, %v709_v34 }
 0x35e   :  { %804 = vst [vmem:[#allocation2] sm:$0xff] %v803_v37  }
 0x35f   :  { %1001 = shalt.err (!%p998_p4)
}
 0x360   :  { %s1015_s5 = smov 64   ;;  %s1016_s15 = smov 4  }
 0x361   :  { %736 = dma.vmem_to_hbm [thread:$0]  %s731_s14, 128, %s1287_s11, [#allocation3], %s1015_s5, %s1015_s5, %s1016_s15  }
 0x362   :  { %1010 = dma.done.wait [#allocation3], 128  }
 0x363   :  { %1011 = vsyncadd [#allocation3], 4294967168 }
 0x364   :  { %740 = vsyncpa [#allocation3], 1 }

</bundles_post_ra>
